<compile_context>
chip_gen: v5e
topology: v5e:2x2
jax: 0.10.0
libtpu: 0.0.40
codegen_flags: <defaults>
</compile_context>

<pallas_src>
import jax
import jax.numpy as jnp
import numpy as np
from jax.experimental import pallas as pl
from jax.experimental.pallas import tpu as pltpu


_VMEM_BUDGET_BYTES = 20 * 1024 * 1024   # buffer budget used for plan selection
_VMEM_LIMIT_BYTES = 32 * 1024 * 1024    # explicit scoped-VMEM limit (safe v5e/v6e/v7x)


def _round_up(x, m):
    return ((x + m - 1) // m) * m


# ---------------------------------------------------------------------------
# Kernels
# ---------------------------------------------------------------------------

def _gemm_resident_kernel(a_ref, b_ref, o_ref):
    """Resident-weight GEMM: one (TM, Cp) output stripe per grid step.

    a_ref: (TM, Kc)  im2col rows, streamed over the 1-D M grid
    b_ref: (Kc, Cp)  full reshaped weight; grid-invariant -> fetched from HBM once
    o_ref: (TM, Cp)  Cp % 128 == 0 -> unmasked lane-dense stores
    """
    o_ref[...] = jnp.dot(
        a_ref[...], b_ref[...], preferred_element_type=jnp.float32
    ).astype(o_ref.dtype)


def _gemm_ktiled_kernel(a_ref, b_ref, o_ref, acc_ref):
    """K-tiled GEMM with f32 VMEM accumulator (used when K*K*Cin is large)."""
    @pl.when(pl.program_id(2) == 0)
    def _():
        acc_ref[...] = jnp.zeros_like(acc_ref)

    acc_ref[...] += jnp.dot(
        a_ref[...], b_ref[...], preferred_element_type=jnp.float32
    )

    @pl.when(pl.program_id(2) == pl.num_programs(2) - 1)
    def _():
        o_ref[...] = acc_ref[...].astype(o_ref.dtype)


# ---------------------------------------------------------------------------
# Wrapper
# ---------------------------------------------------------------------------

def conv2d_pallas(x_nchw, weight_oihw, stride=1, padding=0, *,
                  weight_gemm=None, compute_dtype=None,
                  tile_m=512, tile_n=128, tile_k=None, plan=None):
    """torch.nn.functional.conv2d(x, w, stride, padding) with bias=False.

    plan: None (auto), "resident" (grid-invariant weight), or "ktiled"
          (3-D grid with K-axis accumulation).
    """
    n, c_in, h, w = x_nchw.shape
    c_out, c_in_w, kh_, kw_ = weight_oihw.shape
    assert c_in == c_in_w and kh_ == kw_, "square kernel, matching in_channels"
    k = kh_

    hp, wp = h + 2 * padding, w + 2 * padding
    h_out = (hp - k) // stride + 1
    w_out = (wp - k) // stride + 1
    out_dtype = x_nchw.dtype

    # ---- im2col layout glue (plain JAX); all MACs happen in the Pallas GEMM.
    x_nhwc = jnp.transpose(x_nchw, (0, 2, 3, 1))
    x_pad = jnp.pad(x_nhwc, ((0, 0), (padding, padding), (padding, padding), (0, 0)))

    taps = []
    for kh in range(k):                       # static -> unrolled at trace time
        for kw in range(k):
            taps.append(
                x_pad[:, kh: kh + (h_out - 1) * stride + 1: stride,
                         kw: kw + (w_out - 1) * stride + 1: stride, :]
            )
    patches = jnp.concatenate(taps, axis=-1)  # (N, Ho, Wo, K*K*Cin)

    kc = k * k * c_in
    m = n * h_out * w_out
    a = patches.reshape(m, kc)

    if weight_gemm is None:
        # OIHW -> HWIO -> (K*K*Cin, Cout); row order (kh*K + kw)*Cin + cin
        # matches the tap concatenation order above.
        weight_gemm = jnp.transpose(weight_oihw, (2, 3, 1, 0)).reshape(kc, c_out)
    b = weight_gemm

    if compute_dtype is not None:             # e.g. jnp.bfloat16 on v6e/v7x
        a = a.astype(compute_dtype)
        b = b.astype(compute_dtype)
    itemsize = a.dtype.itemsize
    out_itemsize = np.dtype(out_dtype).itemsize

    # ---- Plan selection (explicit VMEM budgeting; portable to v7x's 64 MiB).
    kcp128 = _round_up(kc, 128)               # lane/MXU-friendly contraction pad
    cp = _round_up(c_out, tile_n)             # lane-dense output channels
    tm_top = min(tile_m, _round_up(m, 128))   # don't over-tile tiny M

    chosen = None
    if plan in (None, "resident"):
        for tm in sorted({tm_top, min(tm_top, 256), min(tm_top, 128)}, reverse=True):
            # A double-buffered, B (counted x2 to be safe), out double-buffered.
            need = itemsize * (2 * tm * kcp128 + 2 * kcp128 * cp) + out_itemsize * 2 * tm * cp
            if plan == "resident" or need <= _VMEM_BUDGET_BYTES:
                chosen = ("resident", tm, kcp128)
                break
    if chosen is None:
        tk = tile_k if tile_k is not None else 512
        tk = min(_round_up(tk, 128), kcp128)
        chosen = ("ktiled", tm_top, tk)

    flops = 2 * m * kc * c_out

    if chosen[0] == "resident":
        _, tm, kcp = chosen
        mp = _round_up(m, tm)
        a = jnp.pad(a, ((0, mp - m), (0, kcp - kc)))
        b = jnp.pad(b, ((0, kcp - kc), (0, cp - c_out)))

        cost = pl.CostEstimate(
            flops=flops,
            transcendentals=0,
            bytes_accessed=int(a.size * itemsize + b.size * itemsize
                               + mp * cp * out_itemsize),
        )
        out = pl.pallas_call(
            _gemm_resident_kernel,
            out_shape=jax.ShapeDtypeStruct((mp, cp), out_dtype),
            grid=(mp // tm,),
            in_specs=[
                pl.BlockSpec((tm, kcp), lambda i: (i, 0)),    # streamed im2col rows
                pl.BlockSpec((kcp, cp), lambda i: (0, 0)),    # weight: fetched once
            ],
            out_specs=pl.BlockSpec((tm, cp), lambda i: (i, 0)),
            compiler_params=pltpu.CompilerParams(
                dimension_semantics=("parallel",),
                vmem_limit_bytes=_VMEM_LIMIT_BYTES,
                allow_input_fusion=[True, False],
            ),
            cost_estimate=cost,
        )(a, b)
    else:
        _, tm, tk = chosen
        kcp = _round_up(kc, tk)
        mp = _round_up(m, tm)
        a = jnp.pad(a, ((0, mp - m), (0, kcp - kc)))
        b = jnp.pad(b, ((0, kcp - kc), (0, cp - c_out)))

        num_i, num_j, num_k = mp // tm, cp // tile_n, kcp // tk
        cost = pl.CostEstimate(
            flops=flops,
            transcendentals=0,
            bytes_accessed=int(a.size * itemsize * num_j
                               + b.size * itemsize * num_i
                               + mp * cp * out_itemsize),
        )
        out = pl.pallas_call(
            _gemm_ktiled_kernel,
            out_shape=jax.ShapeDtypeStruct((mp, cp), out_dtype),
            grid=(num_i, num_j, num_k),
            in_specs=[
                pl.BlockSpec((tm, tk), lambda i, j, kk: (i, kk)),
                pl.BlockSpec((tk, tile_n), lambda i, j, kk: (kk, j)),
            ],
            out_specs=pl.BlockSpec((tm, tile_n), lambda i, j, kk: (i, j)),
            scratch_shapes=[pltpu.VMEM((tm, tile_n), jnp.float32)],
            compiler_params=pltpu.CompilerParams(
                dimension_semantics=("parallel", "parallel", "arbitrary"),
                vmem_limit_bytes=_VMEM_LIMIT_BYTES,
                allow_input_fusion=[True, False],
            ),
            cost_estimate=cost,
        )(a, b)

    out = out[:m, :c_out].reshape(n, h_out, w_out, c_out)
    return jnp.transpose(out, (0, 3, 1, 2))   # back to NCHW


class Conv2d:
    """JAX/Pallas port of the PyTorch Conv2d module (bias=False)."""

    def __init__(self, in_channels, out_channels, kernel_size, stride=1, padding=0,
                 *, key, compute_dtype=None):
        self.in_channels = in_channels
        self.out_channels = out_channels
        self.kernel_size = kernel_size
        self.stride = stride
        self.padding = padding
        self.compute_dtype = compute_dtype
        # Deterministic analogue of the torch init: U(-1, 1) / sqrt(Cin * K * K)
        w = jax.random.uniform(
            key,
            (out_channels, in_channels, kernel_size, kernel_size),
            minval=-1.0,
            maxval=1.0,
            dtype=jnp.float32,
        )
        self.weight = w * (1.0 / np.sqrt(in_channels * kernel_size * kernel_size))
        # Precompute the GEMM layout of the weight once (per-call transpose removed).
        self.weight_gemm = jnp.transpose(self.weight, (2, 3, 1, 0)).reshape(
            kernel_size * kernel_size * in_channels, out_channels)

    def __call__(self, x):
        return conv2d_pallas(
            x, self.weight, stride=self.stride, padding=self.padding,
            weight_gemm=self.weight_gemm, compute_dtype=self.compute_dtype)


if __name__ == "__main__":
    key = jax.random.PRNGKey(0)
    k_x, k_w, k_x2, k_w2 = jax.random.split(key, 4)

    # ---- Test 1: module shapes (auto -> resident-weight plan).
    x = jax.random.normal(k_x, (2, 4, 16, 16), dtype=jnp.float32)
    conv = Conv2d(in_channels=4, out_channels=8, kernel_size=3, stride=2, padding=1, key=k_w)
    y = jax.block_until_ready(conv(x))

    y_ref = jax.lax.conv_general_dilated(
        x, conv.weight,
        window_strides=(2, 2),
        padding=[(1, 1), (1, 1)],
        dimension_numbers=("NCHW", "OIHW", "NCHW"),
        precision=jax.lax.Precision.HIGHEST,
    )
    np.testing.assert_allclose(np.asarray(y), np.asarray(y_ref), rtol=1e-5, atol=1e-5)
    assert y.shape == (2, 8, 8, 8)

    # ---- Test 2: force the K-tiled accumulator plan (auto-selected for large
    # K*K*Cin); exercises multi-step contraction + pl.when init/finalize.
    x2 = jax.random.normal(k_x2, (2, 40, 12, 12), dtype=jnp.float32)
    w2 = jax.random.normal(k_w2, (16, 40, 3, 3), dtype=jnp.float32) * 0.05
    y2 = jax.block_until_ready(
        conv2d_pallas(x2, w2, stride=1, padding=1, plan="ktiled", tile_k=128))
    y2_ref = jax.lax.conv_general_dilated(
        x2, w2,
        window_strides=(1, 1),
        padding=[(1, 1), (1, 1)],
        dimension_numbers=("NCHW", "OIHW", "NCHW"),
        precision=jax.lax.Precision.HIGHEST,
    )
    np.testing.assert_allclose(np.asarray(y2), np.asarray(y2_ref), rtol=1e-4, atol=1e-4)
    assert y2.shape == (2, 16, 12, 12)

    print("KERNEL_OK")
</pallas_src>

<mosaic_0001>
module attributes {stable_mosaic.version = 11 : i64} {
  func.func @_gemm_resident_kernel(%arg0: i32, %arg1: memref<128x128xf32, #tpu.memory_space<vmem>>, %arg2: memref<128x128xf32, #tpu.memory_space<vmem>>, %arg3: memref<128x128xf32, #tpu.memory_space<vmem>>) attributes {dimension_semantics = [#tpu.dimension_semantics<parallel>], iteration_bounds = array<i64: 1>, scalar_prefetch = 0 : i64, scratch_operands = 0 : i64, tpu.core_type = #tpu.core_type<tc>, window_params = [{transform_indices = @transform_0, window_bounds = array<i64: 128, 128>}, {pipeline_mode = #tpu.pipeline_mode<synchronous>, transform_indices = @transform_1, window_bounds = array<i64: 128, 128>}, {transform_indices = @transform_2, window_bounds = array<i64: 128, 128>}]} {
    %c0 = arith.constant 0 : index
    %c0_0 = arith.constant 0 : index
    %0 = vector.load %arg1[%c0, %c0_0] : memref<128x128xf32, #tpu.memory_space<vmem>>, vector<128x128xf32>
    %c0_1 = arith.constant 0 : index
    %c0_2 = arith.constant 0 : index
    %1 = vector.load %arg2[%c0_1, %c0_2] : memref<128x128xf32, #tpu.memory_space<vmem>>, vector<128x128xf32>
    %cst = arith.constant dense<0.000000e+00> : vector<128x128xf32>
    %2 = tpu.matmul %0, %1, %cst {dimension_numbers = #tpu.dot_dimension_numbers<[1], [0], [0], [1], [0, 0, 1, 1], [], []>} : vector<128x128xf32>, vector<128x128xf32>, vector<128x128xf32> -> vector<128x128xf32>
    %c0_3 = arith.constant 0 : index
    %c0_4 = arith.constant 0 : index
    %3 = vector.load %arg3[%c0_3, %c0_4] : memref<128x128xf32, #tpu.memory_space<vmem>>, vector<128x128xf32>
    tpu.vector_store %arg3[%c0_3, %c0_4], %2 {strides = array<i32>} : memref<128x128xf32, #tpu.memory_space<vmem>>, vector<128x128xf32>,
    return
  }
  func.func @transform_0(%arg0: i32) -> (i32, i32) {
    %c0_i32 = arith.constant 0 : i32
    %c0_i32_0 = arith.constant 0 : i32
    return %arg0, %c0_i32 : i32, i32
  }
  func.func @transform_1(%arg0: i32) -> (i32, i32) {
    %c0_i32 = arith.constant 0 : i32
    %c0_i32_0 = arith.constant 0 : i32
    %c0_i32_1 = arith.constant 0 : i32
    return %c0_i32, %c0_i32_0 : i32, i32
  }
  func.func @transform_2(%arg0: i32) -> (i32, i32) {
    %c0_i32 = arith.constant 0 : i32
    %c0_i32_0 = arith.constant 0 : i32
    return %arg0, %c0_i32 : i32, i32
  }
}

</mosaic_0001>

<bundles_post_ra>
// kernel: tpu_custom_call.1
= control target key start
LH: loop header
LB: loop body
LE: loop exit
PB: predicated region body
PF: predicated region fallthrough
CT: control target
= control target key end

     0   :  { %7 = vsyncpa [#allocation3], 0  ;;  %s346_s0 = inlined_call_operand.hbm [shape: f32[128,128], index: 0, kind: input, shape index: {}]   ;;  %s347_s1 = inlined_call_operand.hbm [shape: f32[128,128], index: 1, kind: input, shape index: {}]   ;;  %s348_s2 = inlined_call_operand.hbm [shape: f32[128,128], index: 2, kind: output, shape index: {}]  }
   0x1   :  { %8 = vsyncpa [#allocation6], 0 }
   0x2   :  { %9 = vsyncpa [#allocation4], 0  ;;  %s14_s11 = sshll.u32 %s346_s0, 4  ;;  %s308_s12 = smov [#allocation2]   ;;  %s15_s11 = int_to_ptr.hbm [resolvable:$true] %s14_s11 }
   0x3   :  { %s16_s13 = sshll.u32 %s308_s12, 4  ;;  %s27_s16 = sshll.u32 %s347_s1, 4  ;;  %s17_s13 = int_to_ptr.vmem [resolvable:$true] %s16_s13  ;;  %s28_s16 = int_to_ptr.hbm [resolvable:$true] %s27_s16 }
   0x4   :  { %s309_s17 = smov 128   ;;  %s310_s18 = smov 8  }
   0x5   :  { %22 = dma.hbm_to_vmem [thread:$0]  %s15_s11, 2048, %s17_s13, [#allocation3], %s309_s17, %s309_s17, %s310_s18  }
   0x6   :  { %s311_s19 = smov [#allocation5]  }
   0x7   :  { %s29_s20 = sshll.u32 %s311_s19, 4  ;;  %s30_s20 = int_to_ptr.vmem [resolvable:$true] %s29_s20 }
   0x8   :  { %35 = dma.hbm_to_vmem [thread:$0]  %s28_s16, 2048, %s30_s20, [#allocation6], %s309_s17, %s309_s17, %s310_s18  }
   0x9   :  { %302 = dma.done.wait [#allocation3], 2048  }
   0xa   :  { %303 = vsyncadd [#allocation3], 4294965248 }
   0xb   :  { %304 = dma.done.wait [#allocation6], 2048  }
   0xc   :  { %305 = vsyncadd [#allocation6], 4294965248  ;;  %v75_v0 = vld [vmem:[#allocation5 + $0x78] sm:$0xff]  ;;  %v74_v1 = vld [vmem:[#allocation5 + $0x70] sm:$0xff]  ;;  %s312_s0 = smov [#allocation7]   ;;  %s163_s23 = sshll.u32 %s348_s2, 4  ;;  %s164_s23 = int_to_ptr.hbm [resolvable:$true] %s163_s23 }
   0xd   :  { %178 = vmatpush.msra.mxu2 %v75_v0  ;;  %179 = vmatpush.msra.mxu3 %v75_v0  ;;  %v73_v2 = vld [vmem:[#allocation5 + $0x68] sm:$0xff]  ;;  %v72_v3 = vld [vmem:[#allocation5 + $0x60] sm:$0xff]  ;;  %v71_v4 = vld [vmem:[#allocation5 + $0x58] sm:$0xff]  ;;  %s161_s1 = sshll.u32 %s312_s0, 4  ;;  %s162_s1 = int_to_ptr.vmem [resolvable:$true] %s161_s1 }
   0xe   :  { %76 = vmatpush.msra.mxu0 %v75_v0  ;;  %177 = vmatpush.msra.mxu1 %v75_v0  ;;  %v70_v5 = vld [vmem:[#allocation5 + $0x50] sm:$0xff]  ;;  %v69_v6 = vld [vmem:[#allocation5 + $0x48] sm:$0xff]  ;;  %v68_v7 = vld [vmem:[#allocation5 + $0x40] sm:$0xff] }
   0xf   :  { %181 = vmatpush.msra.mxu2 %v74_v1  ;;  %182 = vmatpush.msra.mxu3 %v74_v1  ;;  %v67_v8 = vld [vmem:[#allocation5 + $0x38] sm:$0xff]  ;;  %v66_v9 = vld [vmem:[#allocation5 + $0x30] sm:$0xff]  ;;  %v65_v10 = vld [vmem:[#allocation5 + $0x28] sm:$0xff] }
  0x10   :  { %77 = vmatpush.msra.mxu0 %v74_v1  ;;  %180 = vmatpush.msra.mxu1 %v74_v1  ;;  %v64_v11 = vld [vmem:[#allocation5 + $0x20] sm:$0xff]  ;;  %v63_v12 = vld [vmem:[#allocation5 + $0x18] sm:$0xff]  ;;  %v62_v13 = vld [vmem:[#allocation5 + $0x10] sm:$0xff] }
  0x11   :  { %184 = vmatpush.msra.mxu2 %v73_v2  ;;  %185 = vmatpush.msra.mxu3 %v73_v2  ;;  %v61_v14 = vld [vmem:[#allocation5 + $0x8] sm:$0xff]  ;;  %v60_v15 = vld [vmem:[#allocation5] sm:$0xff]  ;;  %v54_v24 = vld [vmem:[#allocation2 + $0x50] sm:$0xff] }
  0x12   :  { %78 = vmatpush.msra.mxu0 %v73_v2  ;;  %183 = vmatpush.msra.mxu1 %v73_v2  ;;  %v52_v16 = vld [vmem:[#allocation2 + $0x40] sm:$0xff]  ;;  %v53_v20 = vld [vmem:[#allocation2 + $0x48] sm:$0xff]  ;;  %v58_v25 = vld [vmem:[#allocation2 + $0x70] sm:$0xff] }
  0x13   :  { %187 = vmatpush.msra.mxu2 %v72_v3  ;;  %188 = vmatpush.msra.mxu3 %v72_v3  ;;  %v56_v17 = vld [vmem:[#allocation2 + $0x60] sm:$0xff]  ;;  %v57_v21 = vld [vmem:[#allocation2 + $0x68] sm:$0xff]  ;;  %v46_v26 = vld [vmem:[#allocation2 + $0x10] sm:$0xff] }
  0x14   :  { %79 = vmatpush.msra.mxu0 %v72_v3  ;;  %186 = vmatpush.msra.mxu1 %v72_v3  ;;  %v44_v18 = vld [vmem:[#allocation2] sm:$0xff]  ;;  %v45_v22 = vld [vmem:[#allocation2 + $0x8] sm:$0xff]  ;;  %v50_v27 = vld [vmem:[#allocation2 + $0x30] sm:$0xff] }
  0x15   :  { %190 = vmatpush.msra.mxu2 %v71_v4  ;;  %191 = vmatpush.msra.mxu3 %v71_v4  ;;  %v48_v19 = vld [vmem:[#allocation2 + $0x20] sm:$0xff]  ;;  %v49_v23 = vld [vmem:[#allocation2 + $0x28] sm:$0xff]  ;;  %v55_v28 = vld [vmem:[#allocation2 + $0x58] sm:$0xff] }
  0x16   :  { %80 = vmatpush.msra.mxu0 %v71_v4  ;;  %189 = vmatpush.msra.mxu1 %v71_v4  ;;  %v59_v29 = vld [vmem:[#allocation2 + $0x78] sm:$0xff] }
  0x17   :  { %193 = vmatpush.msra.mxu2 %v70_v5  ;;  %194 = vmatpush.msra.mxu3 %v70_v5  ;;  %v47_v30 = vld [vmem:[#allocation2 + $0x18] sm:$0xff] }
  0x18   :  { %81 = vmatpush.msra.mxu0 %v70_v5  ;;  %192 = vmatpush.msra.mxu1 %v70_v5  ;;  %v51_v31 = vld [vmem:[#allocation2 + $0x38] sm:$0xff] }
  0x19   :  { %196 = vmatpush.msra.mxu2 %v69_v6  ;;  %197 = vmatpush.msra.mxu3 %v69_v6 }
  0x1a   :  { %82 = vmatpush.msra.mxu0 %v69_v6  ;;  %195 = vmatpush.msra.mxu1 %v69_v6 }
  0x1b   :  { %199 = vmatpush.msra.mxu2 %v68_v7  ;;  %200 = vmatpush.msra.mxu3 %v68_v7 }
  0x1c   :  { %83 = vmatpush.msra.mxu0 %v68_v7  ;;  %198 = vmatpush.msra.mxu1 %v68_v7 }
  0x1d   :  { %202 = vmatpush.msra.mxu2 %v67_v8  ;;  %203 = vmatpush.msra.mxu3 %v67_v8 }
  0x1e   :  { %84 = vmatpush.msra.mxu0 %v67_v8  ;;  %201 = vmatpush.msra.mxu1 %v67_v8 }
  0x1f   :  { %205 = vmatpush.msra.mxu2 %v66_v9  ;;  %206 = vmatpush.msra.mxu3 %v66_v9 }
  0x20   :  { %85 = vmatpush.msra.mxu0 %v66_v9  ;;  %204 = vmatpush.msra.mxu1 %v66_v9 }
  0x21   :  { %208 = vmatpush.msra.mxu2 %v65_v10  ;;  %209 = vmatpush.msra.mxu3 %v65_v10 }
  0x22   :  { %86 = vmatpush.msra.mxu0 %v65_v10  ;;  %207 = vmatpush.msra.mxu1 %v65_v10 }
  0x23   :  { %211 = vmatpush.msra.mxu2 %v64_v11  ;;  %212 = vmatpush.msra.mxu3 %v64_v11 }
  0x24   :  { %87 = vmatpush.msra.mxu0 %v64_v11  ;;  %210 = vmatpush.msra.mxu1 %v64_v11 }
  0x25   :  { %214 = vmatpush.msra.mxu2 %v63_v12  ;;  %215 = vmatpush.msra.mxu3 %v63_v12 }
  0x26   :  { %88 = vmatpush.msra.mxu0 %v63_v12  ;;  %213 = vmatpush.msra.mxu1 %v63_v12 }
  0x27   :  { %217 = vmatpush.msra.mxu2 %v62_v13  ;;  %218 = vmatpush.msra.mxu3 %v62_v13 }
  0x28   :  { %89 = vmatpush.msra.mxu0 %v62_v13  ;;  %216 = vmatpush.msra.mxu1 %v62_v13 }
  0x29   :  { %220 = vmatpush.msra.mxu2 %v61_v14  ;;  %221 = vmatpush.msra.mxu3 %v61_v14 }
  0x2a   :  { %90 = vmatpush.msra.mxu0 %v61_v14  ;;  %219 = vmatpush.msra.mxu1 %v61_v14 }
  0x2b   :  { %223 = vmatpush.msra.mxu2 %v60_v15  ;;  %224 = vmatpush.msra.mxu3 %v60_v15 }
  0x2c   :  { %116 = vmatmul.f32.vlgmr.msra.gmra.mxu2 %v52_v16  ;;  %128 = vmatmul.f32.vlgmr.msra.gmra.mxu3 %v56_v17 }
  0x2d   :  { %91 = vmatpush.msra.mxu0 %v60_v15  ;;  %222 = vmatpush.msra.mxu1 %v60_v15 }
  0x2e   :  { %92 = vmatmul.f32.vlgmr.msra.gmra.mxu0 %v44_v18  ;;  %104 = vmatmul.f32.vlgmr.msra.gmra.mxu1 %v48_v19 }
  0x34   :  { %119 = vmatmul.f32.gmra.mxu2 %v53_v20  ;;  %131 = vmatmul.f32.gmra.mxu3 %v57_v21 }
  0x36   :  { %95 = vmatmul.f32.gmra.mxu0 %v45_v22  ;;  %107 = vmatmul.f32.gmra.mxu1 %v49_v23 }
  0x3c   :  { %122 = vmatmul.f32.gmra.mxu2 %v54_v24  ;;  %134 = vmatmul.f32.gmra.mxu3 %v58_v25 }
  0x3e   :  { %98 = vmatmul.f32.gmra.mxu0 %v46_v26  ;;  %110 = vmatmul.f32.gmra.mxu1 %v50_v27 }
  0x44   :  { %125 = vmatmul.f32.gmra.mxu2 %v55_v28  ;;  %137 = vmatmul.f32.gmra.mxu3 %v59_v29 }
  0x46   :  { %101 = vmatmul.f32.gmra.mxu0 %v47_v30  ;;  %113 = vmatmul.f32.gmra.mxu1 %v51_v31 }
  0xab   :  { %v93_v32 = vpop.f32.mrf.mxu0  ;;  %v105_v33 = vpop.f32.mrf.mxu1 }
  0xac   :  { %141 = vst [vmem:[#allocation7] sm:$0xff] %v93_v32 }
  0xad   :  { %145 = vst [vmem:[#allocation7 + $0x20] sm:$0xff] %v105_v33 }
  0xaf   :  { %v117_v34 = vpop.f32.mrf.mxu2  ;;  %v129_v35 = vpop.f32.mrf.mxu3 }
  0xb0   :  { %149 = vst [vmem:[#allocation7 + $0x40] sm:$0xff] %v117_v34 }
  0xb1   :  { %153 = vst [vmem:[#allocation7 + $0x60] sm:$0xff] %v129_v35 }
  0xb3   :  { %v96_v36 = vpop.f32.mrf.mxu0  ;;  %v108_v37 = vpop.f32.mrf.mxu1 }
  0xb4   :  { %142 = vst [vmem:[#allocation7 + $0x8] sm:$0xff] %v96_v36 }
  0xb5   :  { %146 = vst [vmem:[#allocation7 + $0x28] sm:$0xff] %v108_v37 }
  0xb7   :  { %v120_v38 = vpop.f32.mrf.mxu2  ;;  %v132_v39 = vpop.f32.mrf.mxu3 }
  0xb8   :  { %150 = vst [vmem:[#allocation7 + $0x48] sm:$0xff] %v120_v38 }
  0xb9   :  { %154 = vst [vmem:[#allocation7 + $0x68] sm:$0xff] %v132_v39 }
  0xbb   :  { %v99_v40 = vpop.f32.mrf.mxu0  ;;  %v111_v41 = vpop.f32.mrf.mxu1 }
  0xbc   :  { %143 = vst [vmem:[#allocation7 + $0x10] sm:$0xff] %v99_v40 }
  0xbd   :  { %147 = vst [vmem:[#allocation7 + $0x30] sm:$0xff] %v111_v41 }
  0xbf   :  { %v123_v42 = vpop.f32.mrf.mxu2  ;;  %v135_v43 = vpop.f32.mrf.mxu3 }
  0xc0   :  { %151 = vst [vmem:[#allocation7 + $0x50] sm:$0xff] %v123_v42 }
  0xc1   :  { %155 = vst [vmem:[#allocation7 + $0x70] sm:$0xff] %v135_v43 }
  0xc3   :  { %v102_v44 = vpop.f32.mrf.mxu0  ;;  %v114_v45 = vpop.f32.mrf.mxu1 }
  0xc4   :  { %144 = vst [vmem:[#allocation7 + $0x18] sm:$0xff] %v102_v44 }
  0xc5   :  { %148 = vst [vmem:[#allocation7 + $0x38] sm:$0xff] %v114_v45 }
  0xc7   :  { %v126_v46 = vpop.f32.mrf.mxu2  ;;  %v138_v47 = vpop.f32.mrf.mxu3 }
  0xc8   :  { %152 = vst [vmem:[#allocation7 + $0x58] sm:$0xff] %v126_v46 }
  0xc9   :  { %156 = vst [vmem:[#allocation7 + $0x78] sm:$0xff] %v138_v47 }
  0xca   :  { %169 = dma.vmem_to_hbm [thread:$0]  %s162_s1, 2048, %s164_s23, [#allocation4], %s309_s17, %s309_s17, %s310_s18  }
  0xcb   :  { %306 = dma.done.wait [#allocation4], 2048  }
  0xcc   :  { %307 = vsyncadd [#allocation4], 4294965248 }
  0xcd   :  { %174 = vsyncpa [#allocation3], 1 }
  0xce   :  { %175 = vsyncpa [#allocation6], 1 }
  0xcf   :  { %176 = vsyncpa [#allocation4], 1 }

</bundles_post_ra>
